<compile_context>
chip_gen: v6e
topology: v6e:2x2x1
jax: 0.10.0
libtpu: 0.0.40
codegen_flags: <defaults>
</compile_context>

<pallas_src>
import functools

import jax
import jax.numpy as jnp
from jax import lax
from jax.experimental import pallas as pl
from jax.experimental.pallas import tpu as pltpu

CONV_OUT4 = 256        # channels after conv4 / into global max pool
LINEAR_OUT = 512
BN_EPS = 1e-5
TAU_MAX = 1.0          # undefined in source snippet; assume 1.0
OUT_LANES = 128        # lane-dense padded output width (>= jnt_dim)
TILE_N_MAX = 1024      # max points per grid step
FEAT_BUF_BUDGET = 4 * 1024 * 1024   # bytes per feat VMEM buffer (x2 for dbl-buf)


def actor_head_kernel(feat_ref, pgb_ref, s1_ref, t1_ref,
                      w_feat_ref, w_out_ref, b_out_ref,
                      out_ref, mx_ref,
                      *, n_points, tile_n, n_batch, need_mask):
    k = pl.program_id(0)          # points-tile index ("arbitrary" / reduction)

    # ---- MinkowskiGlobalMaxPooling: running max over the points axis --------
    @pl.when(k == 0)
    def _():
        mx_ref[...] = jnp.full(mx_ref.shape, -jnp.inf, mx_ref.dtype)

    if need_mask:
        # Tail tile may read past N (garbage rows): mask them to -inf so they
        # can never win the max.  Static flag: only traced when N % tile_n != 0.
        row = lax.broadcasted_iota(jnp.int32, (tile_n, 1), 0) + k * tile_n
        valid = row < n_points

    for bb in range(n_batch):                              # static, B is small
        sub = feat_ref[bb]                                 # (tile_n, C) bf16
        if need_mask:
            sub = jnp.where(valid, sub, jnp.array(-jnp.inf, sub.dtype))
        # max is exact in bf16; promote only the (1, C) partial to f32.
        tile_max = jnp.max(sub, axis=0, keepdims=True)     # (1, C) bf16
        cur = mx_ref[pl.ds(bb, 1), :]
        mx_ref[pl.ds(bb, 1), :] = jnp.maximum(cur, tile_max.astype(jnp.float32))

    # ---- dense head: only on the last points tile (epilogue), batched M=B ---
    @pl.when(k == pl.num_programs(0) - 1)
    def _():
        # norm: BatchNorm1d(256) eval (scale/shift prefolded) + ReLU; dropout1=id
        x = jnp.maximum(mx_ref[...] * s1_ref[...] + t1_ref[...], 0.0)  # (B,256)

        # linear: Linear(256+2J, 512) on cat(jnt_pos, jnt_goal, x).
        # pg @ W_pg + b1 (with eval-mode BatchNorm1d(512) folded in) was
        # hoisted to the wrapper and arrives as pgb_ref (B,512) f32.
        h = jnp.dot(x.astype(jnp.bfloat16), w_feat_ref[...],
                    preferred_element_type=jnp.float32) + pgb_ref[...]
        h = jnp.maximum(h, 0.0)                                         # (B,512)
        # dropout2 = identity (eval)

        # out: Linear(512, J) (lane-padded to OUT_LANES) + Tanh, * tau_max
        y = jnp.tanh(jnp.dot(h.astype(jnp.bfloat16), w_out_ref[...],
                             preferred_element_type=jnp.float32)
                     + b_out_ref[...])
        out_ref[...] = (y * TAU_MAX).astype(out_ref.dtype)


def _actor_forward(feat, jnt_pos, jnt_goal, prep):
    """feat: (B, N, CONV_OUT4) post-conv4 per-point features (bf16 preferred).
    jnt_pos, jnt_goal: (B, J). prep: output of prepare_params()."""
    B, N, C = feat.shape
    J = jnt_pos.shape[1]
    assert C == CONV_OUT4 and J <= OUT_LANES

    feat = feat.astype(jnp.bfloat16)                    # no-op if already bf16

    # Hoisted pg path: (B,2J) x (2J,512) f32 matmul + folded-BN bias in XLA.
    pg = jnp.concatenate([jnt_pos, jnt_goal], axis=1).astype(jnp.float32)
    pgb = jnp.dot(pg, prep["w_pg"], preferred_element_type=jnp.float32) + prep["b1"]

    # Tile-size selection: as large as the VMEM budget allows (re-derived per
    # B so a v6e-friendly tile also fits v7x's smaller VMEM), multiple of 8.
    tile_cap = max(8, (FEAT_BUF_BUDGET // (B * C * 2)) // 8 * 8)
    tile_max = min(TILE_N_MAX, tile_cap)
    if N <= tile_max:
        tile_n, n_tiles, need_mask = N, 1, False        # single full-extent tile
    else:
        tile_n = tile_max
        n_tiles = pl.cdiv(N, tile_n)
        need_mask = (N % tile_n) != 0

    kernel = functools.partial(actor_head_kernel, n_points=N, tile_n=tile_n,
                               n_batch=B, need_mask=need_mask)

    def resident(arr):
        # full-array block, constant index map -> stays resident across grid
        return pl.BlockSpec(arr.shape, lambda k: (0,) * arr.ndim)

    operands = (feat, pgb, prep["s1"], prep["t1"],
                prep["w_feat"], prep["w_out"], prep["b_out"])
    in_specs = [
        pl.BlockSpec((B, tile_n, C), lambda k: (0, k, 0)),
        resident(pgb),
        resident(prep["s1"]), resident(prep["t1"]),
        resident(prep["w_feat"]), resident(prep["w_out"]), resident(prep["b_out"]),
    ]

    out = pl.pallas_call(
        kernel,
        out_shape=jax.ShapeDtypeStruct((B, OUT_LANES), jnp.float32),
        grid_spec=pltpu.PrefetchScalarGridSpec(
            num_scalar_prefetch=0,
            grid=(n_tiles,),
            in_specs=in_specs,
            out_specs=pl.BlockSpec((B, OUT_LANES), lambda k: (0, 0)),
            scratch_shapes=[pltpu.VMEM((B, CONV_OUT4), jnp.float32)],
        ),
        compiler_params=pltpu.CompilerParams(
            dimension_semantics=("arbitrary",),
            vmem_limit_bytes=32 * 1024 * 1024),
    )(*operands)

    return out[:, :J]


actor_forward = jax.jit(_actor_forward)


def init_raw_params(key, jnt_dim):
    """Raw parameters with the PyTorch module's shapes (f32; module is f64)."""
    ks = jax.random.split(key, 4)
    d_in = CONV_OUT4 + 2 * jnt_dim
    lim1 = 1.0 / jnp.sqrt(d_in)
    lim2 = 1.0 / jnp.sqrt(LINEAR_OUT)
    return {
        # nn.BatchNorm1d(conv_out4) with fresh running stats (eval mode)
        "bn1_gamma": jnp.ones((CONV_OUT4,), jnp.float32),
        "bn1_beta": jnp.zeros((CONV_OUT4,), jnp.float32),
        # nn.Linear(conv_out4 + 2*jnt_dim, 512): torch weight (512, d_in),
        # stored transposed as (d_in, 512)
        "w1": jax.random.uniform(ks[0], (d_in, LINEAR_OUT), jnp.float32, -lim1, lim1),
        "b1": jax.random.uniform(ks[1], (LINEAR_OUT,), jnp.float32, -lim1, lim1),
        # nn.BatchNorm1d(linear_out)
        "bn2_gamma": jnp.ones((LINEAR_OUT,), jnp.float32),
        "bn2_beta": jnp.zeros((LINEAR_OUT,), jnp.float32),
        # nn.Linear(512, jnt_dim)
        "w_out": jax.random.uniform(ks[2], (LINEAR_OUT, jnt_dim), jnp.float32,
                                    -lim2, lim2),
        "b_out": jax.random.uniform(ks[3], (jnt_dim,), jnp.float32, -lim2, lim2),
    }


def prepare_params(raw, jnt_dim):
    """One-time fold of eval-mode BatchNorms + layout prep for the kernel."""
    inv_std = 1.0 / jnp.sqrt(1.0 + BN_EPS)              # fresh running var = 1

    # BatchNorm1d(256) eval -> scale/shift (running mean = 0)
    s1 = (raw["bn1_gamma"] * inv_std)[None, :]                          # (1,256)
    t1 = raw["bn1_beta"][None, :]                                       # (1,256)

    # Fold BatchNorm1d(512) eval into Linear(d_in, 512)
    s2 = raw["bn2_gamma"] * inv_std                                     # (512,)
    w1f = raw["w1"] * s2[None, :]
    b1f = (raw["b1"] * s2 + raw["bn2_beta"])[None, :]                   # (1,512)

    # cat order is (jnt_pos, jnt_goal, x): first 2J rows -> pg path (stays f32,
    # consumed by the wrapper), rest -> feat path (bf16, consumed by the kernel)
    w_pg = w1f[: 2 * jnt_dim, :].astype(jnp.float32)                    # (2J,512)
    w_feat = w1f[2 * jnt_dim:, :].astype(jnp.bfloat16)                  # (256,512)

    # lane-dense padded output head
    w_out = jnp.zeros((LINEAR_OUT, OUT_LANES), jnp.float32)
    w_out = w_out.at[:, :jnt_dim].set(raw["w_out"]).astype(jnp.bfloat16)
    b_out = jnp.zeros((1, OUT_LANES), jnp.float32)
    b_out = b_out.at[0, :jnt_dim].set(raw["b_out"])

    return {"s1": s1, "t1": t1, "w_pg": w_pg, "w_feat": w_feat,
            "b1": b1f, "w_out": w_out, "b_out": b_out}


def actor_reference(feat, jnt_pos, jnt_goal, prep, jnt_dim):
    """Pure-JAX reference of the same head (same bf16 quantization of weights/feat)."""
    x = jnp.max(feat.astype(jnp.bfloat16).astype(jnp.float32), axis=1)
    x = jnp.maximum(x * prep["s1"] + prep["t1"], 0.0)
    pg = jnp.concatenate([jnt_pos, jnt_goal], axis=1).astype(jnp.float32)
    h = (jnp.dot(pg, prep["w_pg"], preferred_element_type=jnp.float32)
         + jnp.dot(x.astype(jnp.bfloat16), prep["w_feat"],
                   preferred_element_type=jnp.float32)
         + prep["b1"])
    h = jnp.maximum(h, 0.0)
    y = jnp.tanh(jnp.dot(h.astype(jnp.bfloat16), prep["w_out"],
                         preferred_element_type=jnp.float32) + prep["b_out"])
    return (y * TAU_MAX)[:, :jnt_dim]


if __name__ == "__main__":
    B, N, J = 2, 256, 6   # batch, points per sample, jnt_dim

    key = jax.random.PRNGKey(0)
    k_feat, k_pos, k_goal, k_params = jax.random.split(key, 4)

    # post-conv4 per-point features; the upstream trunk would emit bf16
    feat = jax.random.normal(k_feat, (B, N, CONV_OUT4),
                             jnp.float32).astype(jnp.bfloat16)
    jnt_pos = jax.random.normal(k_pos, (B, J), jnp.float32)
    jnt_goal = jax.random.normal(k_goal, (B, J), jnp.float32)

    raw = init_raw_params(k_params, J)
    prep = prepare_params(raw, J)

    out = actor_forward(feat, jnt_pos, jnt_goal, prep)
    out = jax.block_until_ready(out)

    ref = actor_reference(feat, jnt_pos, jnt_goal, prep, J)
    assert out.shape == (B, J), out.shape
    err = jnp.max(jnp.abs(out - ref))
    assert jnp.allclose(out, ref, atol=1e-3, rtol=1e-3), f"max abs err {err}"

    print("KERNEL_OK")
</pallas_src>

<mosaic_0001>
module attributes {stable_mosaic.version = 11 : i64} {
  func.func @actor_head_kernel(%arg0: i32, %arg1: memref<2x256x256xbf16, #tpu.memory_space<vmem>>, %arg2: memref<2x512xf32, #tpu.memory_space<vmem>>, %arg3: memref<1x256xf32, #tpu.memory_space<vmem>>, %arg4: memref<1x256xf32, #tpu.memory_space<vmem>>, %arg5: memref<256x512xbf16, #tpu.memory_space<vmem>>, %arg6: memref<512x128xbf16, #tpu.memory_space<vmem>>, %arg7: memref<1x128xf32, #tpu.memory_space<vmem>>, %arg8: memref<2x128xf32, #tpu.memory_space<vmem>>, %arg9: memref<2x256xf32, #tpu.memory_space<vmem>>) attributes {dimension_semantics = [#tpu.dimension_semantics<arbitrary>], iteration_bounds = array<i64: 1>, scalar_prefetch = 0 : i64, scratch_operands = 1 : i64, tpu.core_type = #tpu.core_type<tc>, window_params = [{transform_indices = @transform_0, window_bounds = array<i64: 2, 256, 256>}, {pipeline_mode = #tpu.pipeline_mode<synchronous>, transform_indices = @transform_1, window_bounds = array<i64: 2, 512>}, {pipeline_mode = #tpu.pipeline_mode<synchronous>, transform_indices = @transform_2, window_bounds = array<i64: 1, 256>}, {pipeline_mode = #tpu.pipeline_mode<synchronous>, transform_indices = @transform_3, window_bounds = array<i64: 1, 256>}, {pipeline_mode = #tpu.pipeline_mode<synchronous>, transform_indices = @transform_4, window_bounds = array<i64: 256, 512>}, {pipeline_mode = #tpu.pipeline_mode<synchronous>, transform_indices = @transform_5, window_bounds = array<i64: 512, 128>}, {pipeline_mode = #tpu.pipeline_mode<synchronous>, transform_indices = @transform_6, window_bounds = array<i64: 1, 128>}, {pipeline_mode = #tpu.pipeline_mode<synchronous>, transform_indices = @transform_7, window_bounds = array<i64: 2, 128>}]} {
    %c0_i32 = arith.constant 0 : i32
    %0 = arith.cmpi eq, %arg0, %c0_i32 : i32
    %1 = arith.extui %0 : i1 to i32
    %c0_i32_0 = arith.constant 0 : i32
    %2 = arith.cmpi ne, %1, %c0_i32_0 : i32
    scf.if %2 {
      %cst_16 = arith.constant 0xFF800000 : f32
      %22 = vector.broadcast %cst_16 : f32 to vector<2x256xf32>
      %c0_17 = arith.constant 0 : index
      %c0_18 = arith.constant 0 : index
      %23 = vector.load %arg9[%c0_17, %c0_18] : memref<2x256xf32, #tpu.memory_space<vmem>>, vector<2x256xf32>
      tpu.vector_store %arg9[%c0_17, %c0_18], %22 {strides = array<i32>} : memref<2x256xf32, #tpu.memory_space<vmem>>, vector<2x256xf32>,
    } else {
    }
    %c0 = arith.constant 0 : index
    %c0_1 = arith.constant 0 : index
    %c0_2 = arith.constant 0 : index
    %3 = vector.load %arg1[%c0, %c0_1, %c0_2] : memref<2x256x256xbf16, #tpu.memory_space<vmem>>, vector<1x256x256xbf16>
    %4 = vector.shape_cast %3 : vector<1x256x256xbf16> to vector<256x256xbf16>
    %cst = arith.constant dense<0xFF80> : vector<256xbf16>
    %5 = vector.multi_reduction <maximumf>, %4, %cst [0] : vector<256x256xbf16> to vector<256xbf16>
    %6 = vector.shape_cast %5 : vector<256xbf16> to vector<1x256xbf16>
    %c0_3 = arith.constant 0 : index
    %c0_4 = arith.constant 0 : index
    %7 = vector.load %arg9[%c0_3, %c0_4] : memref<2x256xf32, #tpu.memory_space<vmem>>, vector<1x256xf32>
    %8 = arith.extf %6 : vector<1x256xbf16> to vector<1x256xf32>
    %9 = arith.maximumf %7, %8 : vector<1x256xf32>
    %c0_5 = arith.constant 0 : index
    %c0_6 = arith.constant 0 : index
    %10 = vector.load %arg9[%c0_5, %c0_6] : memref<2x256xf32, #tpu.memory_space<vmem>>, vector<1x256xf32>
    tpu.vector_store %arg9[%c0_5, %c0_6], %9 {strides = array<i32>} : memref<2x256xf32, #tpu.memory_space<vmem>>, vector<1x256xf32>,
    %c1 = arith.constant 1 : index
    %c0_7 = arith.constant 0 : index
    %c0_8 = arith.constant 0 : index
    %11 = vector.load %arg1[%c1, %c0_7, %c0_8] : memref<2x256x256xbf16, #tpu.memory_space<vmem>>, vector<1x256x256xbf16>
    %12 = vector.shape_cast %11 : vector<1x256x256xbf16> to vector<256x256xbf16>
    %cst_9 = arith.constant dense<0xFF80> : vector<256xbf16>
    %13 = vector.multi_reduction <maximumf>, %12, %cst_9 [0] : vector<256x256xbf16> to vector<256xbf16>
    %14 = vector.shape_cast %13 : vector<256xbf16> to vector<1x256xbf16>
    %c1_10 = arith.constant 1 : index
    %c0_11 = arith.constant 0 : index
    %15 = vector.load %arg9[%c1_10, %c0_11] : memref<2x256xf32, #tpu.memory_space<vmem>>, vector<1x256xf32>
    %16 = arith.extf %14 : vector<1x256xbf16> to vector<1x256xf32>
    %17 = arith.maximumf %15, %16 : vector<1x256xf32>
    %c1_12 = arith.constant 1 : index
    %c0_13 = arith.constant 0 : index
    %18 = vector.load %arg9[%c1_12, %c0_13] : memref<2x256xf32, #tpu.memory_space<vmem>>, vector<1x256xf32>
    tpu.vector_store %arg9[%c1_12, %c0_13], %17 {strides = array<i32>} : memref<2x256xf32, #tpu.memory_space<vmem>>, vector<1x256xf32>,
    %c0_i32_14 = arith.constant 0 : i32
    %19 = arith.cmpi eq, %arg0, %c0_i32_14 : i32
    %20 = arith.extui %19 : i1 to i32
    %c0_i32_15 = arith.constant 0 : i32
    %21 = arith.cmpi ne, %20, %c0_i32_15 : i32
    scf.if %21 {
      %c0_16 = arith.constant 0 : index
      %c0_17 = arith.constant 0 : index
      %22 = vector.load %arg9[%c0_16, %c0_17] : memref<2x256xf32, #tpu.memory_space<vmem>>, vector<2x256xf32>
      %c0_18 = arith.constant 0 : index
      %c0_19 = arith.constant 0 : index
      %23 = vector.load %arg3[%c0_18, %c0_19] : memref<1x256xf32, #tpu.memory_space<vmem>>, vector<1x256xf32>
      %24 = vector.broadcast %23 : vector<1x256xf32> to vector<2x256xf32>
      %25 = arith.mulf %22, %24 : vector<2x256xf32>
      %c0_20 = arith.constant 0 : index
      %c0_21 = arith.constant 0 : index
      %26 = vector.load %arg4[%c0_20, %c0_21] : memref<1x256xf32, #tpu.memory_space<vmem>>, vector<1x256xf32>
      %27 = vector.broadcast %26 : vector<1x256xf32> to vector<2x256xf32>
      %28 = arith.addf %25, %27 : vector<2x256xf32>
      %cst_22 = arith.constant 0.000000e+00 : f32
      %29 = vector.broadcast %cst_22 : f32 to vector<2x256xf32>
      %30 = arith.maximumf %28, %29 : vector<2x256xf32>
      %31 = arith.truncf %30 : vector<2x256xf32> to vector<2x256xbf16>
      %c0_23 = arith.constant 0 : index
      %c0_24 = arith.constant 0 : index
      %32 = vector.load %arg5[%c0_23, %c0_24] : memref<256x512xbf16, #tpu.memory_space<vmem>>, vector<256x512xbf16>
      %cst_25 = arith.constant dense<0.000000e+00> : vector<2x512xf32>
      %33 = tpu.matmul %31, %32, %cst_25 {dimension_numbers = #tpu.dot_dimension_numbers<[1], [0], [0], [1], [0, 0, 1, 1], [], []>} : vector<2x256xbf16>, vector<256x512xbf16>, vector<2x512xf32> -> vector<2x512xf32>
      %c0_26 = arith.constant 0 : index
      %c0_27 = arith.constant 0 : index
      %34 = vector.load %arg2[%c0_26, %c0_27] : memref<2x512xf32, #tpu.memory_space<vmem>>, vector<2x512xf32>
      %35 = arith.addf %33, %34 : vector<2x512xf32>
      %cst_28 = arith.constant 0.000000e+00 : f32
      %36 = vector.broadcast %cst_28 : f32 to vector<2x512xf32>
      %37 = arith.maximumf %35, %36 : vector<2x512xf32>
      %38 = arith.truncf %37 : vector<2x512xf32> to vector<2x512xbf16>
      %c0_29 = arith.constant 0 : index
      %c0_30 = arith.constant 0 : index
      %39 = vector.load %arg6[%c0_29, %c0_30] : memref<512x128xbf16, #tpu.memory_space<vmem>>, vector<512x128xbf16>
      %cst_31 = arith.constant dense<0.000000e+00> : vector<2x128xf32>
      %40 = tpu.matmul %38, %39, %cst_31 {dimension_numbers = #tpu.dot_dimension_numbers<[1], [0], [0], [1], [0, 0, 1, 1], [], []>} : vector<2x512xbf16>, vector<512x128xbf16>, vector<2x128xf32> -> vector<2x128xf32>
      %c0_32 = arith.constant 0 : index
      %c0_33 = arith.constant 0 : index
      %41 = vector.load %arg7[%c0_32, %c0_33] : memref<1x128xf32, #tpu.memory_space<vmem>>, vector<1x128xf32>
      %42 = vector.broadcast %41 : vector<1x128xf32> to vector<2x128xf32>
      %43 = arith.addf %40, %42 : vector<2x128xf32>
      %44 = math.tanh %43 : vector<2x128xf32>
      %cst_34 = arith.constant 1.000000e+00 : f32
      %45 = vector.broadcast %cst_34 : f32 to vector<2x128xf32>
      %46 = arith.mulf %44, %45 : vector<2x128xf32>
      %c0_35 = arith.constant 0 : index
      %c0_36 = arith.constant 0 : index
      %47 = vector.load %arg8[%c0_35, %c0_36] : memref<2x128xf32, #tpu.memory_space<vmem>>, vector<2x128xf32>
      tpu.vector_store %arg8[%c0_35, %c0_36], %46 {strides = array<i32>} : memref<2x128xf32, #tpu.memory_space<vmem>>, vector<2x128xf32>,
    } else {
    }
    return
  }
  func.func @transform_0(%arg0: i32) -> (i32, i32, i32) {
    %c0_i32 = arith.constant 0 : i32
    %c0_i32_0 = arith.constant 0 : i32
    %c0_i32_1 = arith.constant 0 : i32
    return %c0_i32, %arg0, %c0_i32_0 : i32, i32, i32
  }
  func.func @transform_1(%arg0: i32) -> (i32, i32) {
    %c0_i32 = arith.constant 0 : i32
    %c0_i32_0 = arith.constant 0 : i32
    %c0_i32_1 = arith.constant 0 : i32
    return %c0_i32, %c0_i32_0 : i32, i32
  }
  func.func @transform_2(%arg0: i32) -> (i32, i32) {
    %c0_i32 = arith.constant 0 : i32
    %c0_i32_0 = arith.constant 0 : i32
    %c0_i32_1 = arith.constant 0 : i32
    return %c0_i32, %c0_i32_0 : i32, i32
  }
  func.func @transform_3(%arg0: i32) -> (i32, i32) {
    %c0_i32 = arith.constant 0 : i32
    %c0_i32_0 = arith.constant 0 : i32
    %c0_i32_1 = arith.constant 0 : i32
    return %c0_i32, %c0_i32_0 : i32, i32
  }
  func.func @transform_4(%arg0: i32) -> (i32, i32) {
    %c0_i32 = arith.constant 0 : i32
    %c0_i32_0 = arith.constant 0 : i32
    %c0_i32_1 = arith.constant 0 : i32
    return %c0_i32, %c0_i32_0 : i32, i32
  }
  func.func @transform_5(%arg0: i32) -> (i32, i32) {
    %c0_i32 = arith.constant 0 : i32
    %c0_i32_0 = arith.constant 0 : i32
    %c0_i32_1 = arith.constant 0 : i32
    return %c0_i32, %c0_i32_0 : i32, i32
  }
  func.func @transform_6(%arg0: i32) -> (i32, i32) {
    %c0_i32 = arith.constant 0 : i32
    %c0_i32_0 = arith.constant 0 : i32
    %c0_i32_1 = arith.constant 0 : i32
    return %c0_i32, %c0_i32_0 : i32, i32
  }
  func.func @transform_7(%arg0: i32) -> (i32, i32) {
    %c0_i32 = arith.constant 0 : i32
    %c0_i32_0 = arith.constant 0 : i32
    %c0_i32_1 = arith.constant 0 : i32
    return %c0_i32, %c0_i32_0 : i32, i32
  }
}

</mosaic_0001>

<bundles_post_ra>
// kernel: _actor_forward.1
= control target key start
LH: loop header
LB: loop body
LE: loop exit
PB: predicated region body
PF: predicated region fallthrough
CT: control target
= control target key end

     0   :  { %12 = vsyncpa [#allocation4], 0  ;;  %s2155_s0 = inlined_call_operand.hbm [shape: bf16[2,256,256], index: 0, kind: input, shape index: {}]   ;;  %s2156_s1 = inlined_call_operand.vmem [shape: f32[2,512], index: 1, kind: input, shape index: {}]   ;;  %s2157_s2 = inlined_call_operand.vmem [shape: f32[1,256], index: 2, kind: input, shape index: {}]   ;;  %s2158_s3 = inlined_call_operand.vmem [shape: f32[1,256], index: 3, kind: input, shape index: {}]   ;;  %s2159_s4 = inlined_call_operand.hbm [shape: bf16[256,512], index: 4, kind: input, shape index: {}]   ;;  %s2160_s5 = inlined_call_operand.hbm [shape: bf16[512,128], index: 5, kind: input, shape index: {}]   ;;  %s2161_s6 = inlined_call_operand.vmem [shape: f32[1,128], index: 6, kind: input, shape index: {}]   ;;  %s2162_s7 = inlined_call_operand.hbm [shape: f32[2,128], index: 7, kind: output, shape index: {}]  }
   0x1   :  { %13 = vsyncpa [#allocation7], 0 }
   0x2   :  { %14 = vsyncpa [#allocation5], 0  ;;  %s2057_s24 = smov [#allocation6]  }
   0x3   :  { %s38_s25 = sshll.u32 %s2057_s24, 4  ;;  %s39_s25 = int_to_ptr.vmem [resolvable:$true] %s38_s25 }
   0x4   :  { %s1979_s26 = scalar_lea.vmem %s39_s25, 8192  ;;  %p1984_p1 = scmp.lt.s32.totalorder %s39_s25, %s39_s25 }
   0x5   :  { %p1980_p0 = scmp.ne.s32.totalorder %s39_s25, %s1979_s26  ;;  %p1985_p2 = scmp.lt.s32.totalorder %s1979_s26, %s1979_s26 }
   0x7   :  { %p1986_p3 = por %p1985_p2, %p1984_p1 }
   0x9   :  { %p1987_p4 = pnand %p1986_p3, %p1980_p0 }
   0xb   :  { %1990 = shalt.err (!%p1987_p4)
}
   0xc   :  { %s2058_s27 = smov 256   ;;  %s2059_s28 = smov 16  }
   0xd   :  { %44 = dma.hbm_to_vmem [thread:$0]  %s2159_s4, 8192, %s39_s25, [#allocation7], %s2058_s27, %s2058_s27, %s2059_s28  }
   0xe   :  { %s2060_s8 = smov [#allocation3]  }
   0xf   :  { %s20_s9 = sshll.u32 %s2060_s8, 4  ;;  %s21_s9 = int_to_ptr.vmem [resolvable:$true] %s20_s9 }
  0x10   :  { %s1999_s10 = scalar_lea.vmem %s21_s9, 8192  ;;  %p2004_p6 = scmp.lt.s32.totalorder %s21_s9, %s21_s9 }
  0x11   :  { %p2000_p5 = scmp.ne.s32.totalorder %s21_s9, %s1999_s10  ;;  %p2005_p7 = scmp.lt.s32.totalorder %s1999_s10, %s1999_s10 }
  0x13   :  { %p2006_p8 = por %p2005_p7, %p2004_p6 }
  0x15   :  { %p2007_p9 = pnand %p2006_p8, %p2000_p5 }
  0x17   :  { %2010 = shalt.err (!%p2007_p9)
}
  0x18   :  { %s2061_s11 = smov 128   ;;  %s2062_s12 = smov 8  }
  0x19   :  { %26 = dma.hbm_to_vmem [thread:$0]  %s2155_s0, 8192, %s21_s9, [#allocation4], %s2061_s11, %s2061_s11, %s2062_s12  }
  0x1a   :  { %s2063_s15 = smov [#allocation8]  }
  0x1b   :  { %s50_s16 = sshll.u32 %s2063_s15, 4  ;;  %s51_s16 = int_to_ptr.vmem [resolvable:$true] %s50_s16 }
  0x1c   :  { %s2019_s4 = scalar_lea.vmem %s51_s16, 4096  ;;  %p2024_p11 = scmp.lt.s32.totalorder %s51_s16, %s51_s16 }
  0x1d   :  { %p2020_p10 = scmp.ne.s32.totalorder %s51_s16, %s2019_s4  ;;  %p2025_p12 = scmp.lt.s32.totalorder %s2019_s4, %s2019_s4 }
  0x1f   :  { %p2026_p13 = por %p2025_p12, %p2024_p11 }
  0x21   :  { %p2027_p0 = pnand %p2026_p13, %p2020_p10 }
  0x23   :  { %2030 = shalt.err (!%p2027_p0)
}
  0x24   :  { %s2064_s17 = smov 64   ;;  %s2065_s18 = smov 4  }
  0x25   :  { %56 = dma.hbm_to_vmem [thread:$0]  %s2160_s5, 4096, %s51_s16, [#allocation7], %s2064_s17, %s2064_s17, %s2065_s18  }
  0x26   :  { %2051 = dma.done.wait [#allocation4], 8192  }
  0x27   :  { %2052 = vsyncadd [#allocation4], 4294959104 }
  0x28   :  { %2053 = dma.done.wait [#allocation7], 12288  }
  0x29   :  { %2054 = vsyncadd [#allocation7], 4294955008  ;;  %v2066_v0 = vmov -inf   ;;  %v1744_v1 = vld [vmem:[#allocation6 + $0xe4] ss:$16 sps:$4 sm:$0xff]   ;;  %s2069_s24 = smov [#allocation9]  }
  0x2a   :  { %73 = vst [vmem:[#allocation2] sm:$0xf] %v2066_v0  ;;  %v1746_v2 = vld [vmem:[#allocation6 + $0xec] ss:$16 sps:$4 sm:$0xff]   ;;  %1075 = vmatprep.subr.bf16.mxu0 %v1744_v1  ;;  %v1748_v3 = vld [vmem:[#allocation6 + $0xe0] ss:$16 sps:$4 sm:$0xff]  }
  0x2b   :  { %v1749_v4 = vld [vmem:[#allocation6 + $0xe8] ss:$16 sps:$4 sm:$0xff]   ;;  %1116 = vmatprep.subr.bf16.mxu1 %v1746_v2  ;;  %v1750_v5 = vld [vmem:[#allocation6 + $0xc4] ss:$16 sps:$4 sm:$0xff]   ;;  %1076 = vmatpush1.bf16.msra.mxu0 %v1748_v3  ;;  %v1752_v6 = vld [vmem:[#allocation6 + $0xcc] ss:$16 sps:$4 sm:$0xff]  }
  0x2c   :  { %1117 = vmatpush1.bf16.msra.mxu1 %v1749_v4  ;;  %v1754_v7 = vld [vmem:[#allocation6 + $0xc0] ss:$16 sps:$4 sm:$0xff]   ;;  %1077 = vmatprep.subr.bf16.mxu0 %v1750_v5  ;;  %v1755_v8 = vld [vmem:[#allocation6 + $0xc8] ss:$16 sps:$4 sm:$0xff]   ;;  %v1756_v9 = vld [vmem:[#allocation6 + $0xa4] ss:$16 sps:$4 sm:$0xff]  }
  0x2d   :  { %1118 = vmatprep.subr.bf16.mxu1 %v1752_v6  ;;  %v1758_v10 = vld [vmem:[#allocation6 + $0xac] ss:$16 sps:$4 sm:$0xff]   ;;  %v1760_v11 = vld [vmem:[#allocation6 + $0xa0] ss:$16 sps:$4 sm:$0xff]   ;;  %v1761_v12 = vld [vmem:[#allocation6 + $0xa8] ss:$16 sps:$4 sm:$0xff]  }
  0x2e   :  { %v1762_v13 = vld [vmem:[#allocation6 + $0x84] ss:$16 sps:$4 sm:$0xff]   ;;  %v1764_v14 = vld [vmem:[#allocation6 + $0x8c] ss:$16 sps:$4 sm:$0xff]   ;;  %v1766_v15 = vld [vmem:[#allocation6 + $0x80] ss:$16 sps:$4 sm:$0xff]  }
  0x2f   :  { %1078 = vmatpush1.bf16.msra.mxu0 %v1754_v7  ;;  %v1767_v16 = vld [vmem:[#allocation6 + $0x88] ss:$16 sps:$4 sm:$0xff]   ;;  %v1768_v17 = vld [vmem:[#allocation6 + $0x64] ss:$16 sps:$4 sm:$0xff]   ;;  %v1770_v18 = vld [vmem:[#allocation6 + $0x6c] ss:$16 sps:$4 sm:$0xff]  }
  0x30   :  { %1119 = vmatpush1.bf16.msra.mxu1 %v1755_v8  ;;  %1079 = vmatprep.subr.bf16.mxu0 %v1756_v9  ;;  %v1772_v19 = vld [vmem:[#allocation6 + $0x60] ss:$16 sps:$4 sm:$0xff]   ;;  %v1773_v20 = vld [vmem:[#allocation6 + $0x68] ss:$16 sps:$4 sm:$0xff]   ;;  %v1774_v21 = vld [vmem:[#allocation6 + $0x44] ss:$16 sps:$4 sm:$0xff]  }
  0x31   :  { %1120 = vmatprep.subr.bf16.mxu1 %v1758_v10  ;;  %v1776_v22 = vld [vmem:[#allocation6 + $0x4c] ss:$16 sps:$4 sm:$0xff]   ;;  %v1778_v23 = vld [vmem:[#allocation6 + $0x40] ss:$16 sps:$4 sm:$0xff]   ;;  %v1779_v24 = vld [vmem:[#allocation6 + $0x48] ss:$16 sps:$4 sm:$0xff]  }
  0x32   :  { %v1780_v25 = vld [vmem:[#allocation6 + $0x24] ss:$16 sps:$4 sm:$0xff]   ;;  %v1782_v26 = vld [vmem:[#allocation6 + $0x2c] ss:$16 sps:$4 sm:$0xff]   ;;  %v1784_v27 = vld [vmem:[#allocation6 + $0x20] ss:$16 sps:$4 sm:$0xff]  }
  0x33   :  { %1080 = vmatpush1.bf16.msra.mxu0 %v1760_v11  ;;  %v1785_v28 = vld [vmem:[#allocation6 + $0x28] ss:$16 sps:$4 sm:$0xff]   ;;  %v1786_v29 = vld [vmem:[#allocation6 + $0x4] ss:$16 sps:$4 sm:$0xff]   ;;  %v1788_v30 = vld [vmem:[#allocation6 + $0xc] ss:$16 sps:$4 sm:$0xff]  }
  0x34   :  { %1121 = vmatpush1.bf16.msra.mxu1 %v1761_v12  ;;  %1081 = vmatprep.subr.bf16.mxu0 %v1762_v13  ;;  %v1790_v31 = vld [vmem:[#allocation6] ss:$16 sps:$4 sm:$0xff]   ;;  %v1791_v32 = vld [vmem:[#allocation6 + $0x8] ss:$16 sps:$4 sm:$0xff]   ;;  %v1792_v33 = vld [vmem:[#allocation6 + $0x1e4] ss:$16 sps:$4 sm:$0xff]  }
  0x35   :  { %1122 = vmatprep.subr.bf16.mxu1 %v1764_v14  ;;  %v1794_v34 = vld [vmem:[#allocation6 + $0x1ec] ss:$16 sps:$4 sm:$0xff]   ;;  %v1796_v35 = vld [vmem:[#allocation6 + $0x1e0] ss:$16 sps:$4 sm:$0xff]   ;;  %v1797_v36 = vld [vmem:[#allocation6 + $0x1e8] ss:$16 sps:$4 sm:$0xff]  }
  0x36   :  { %v1798_v37 = vld [vmem:[#allocation6 + $0x1c4] ss:$16 sps:$4 sm:$0xff]   ;;  %v1800_v38 = vld [vmem:[#allocation6 + $0x1cc] ss:$16 sps:$4 sm:$0xff]   ;;  %v1802_v39 = vld [vmem:[#allocation6 + $0x1c0] ss:$16 sps:$4 sm:$0xff]  }
  0x37   :  { %1082 = vmatpush1.bf16.msra.mxu0 %v1766_v15  ;;  %v1803_v40 = vld [vmem:[#allocation6 + $0x1c8] ss:$16 sps:$4 sm:$0xff]   ;;  %v1804_v41 = vld [vmem:[#allocation6 + $0x1a4] ss:$16 sps:$4 sm:$0xff]   ;;  %v1806_v42 = vld [vmem:[#allocation6 + $0x1ac] ss:$16 sps:$4 sm:$0xff]  }
  0x38   :  { %1123 = vmatpush1.bf16.msra.mxu1 %v1767_v16  ;;  %1083 = vmatprep.subr.bf16.mxu0 %v1768_v17  ;;  %v1808_v43 = vld [vmem:[#allocation6 + $0x1a0] ss:$16 sps:$4 sm:$0xff]   ;;  %v1809_v44 = vld [vmem:[#allocation6 + $0x1a8] ss:$16 sps:$4 sm:$0xff]   ;;  %v1810_v45 = vld [vmem:[#allocation6 + $0x184] ss:$16 sps:$4 sm:$0xff]  }
  0x39   :  { %1124 = vmatprep.subr.bf16.mxu1 %v1770_v18  ;;  %v1812_v46 = vld [vmem:[#allocation6 + $0x18c] ss:$16 sps:$4 sm:$0xff]   ;;  %v1814_v47 = vld [vmem:[#allocation6 + $0x180] ss:$16 sps:$4 sm:$0xff]   ;;  %v1815_v48 = vld [vmem:[#allocation6 + $0x188] ss:$16 sps:$4 sm:$0xff]  }
  0x3a   :  { %v1816_v49 = vld [vmem:[#allocation6 + $0x164] ss:$16 sps:$4 sm:$0xff]   ;;  %v1818_v50 = vld [vmem:[#allocation6 + $0x16c] ss:$16 sps:$4 sm:$0xff]   ;;  %v1820_v51 = vld [vmem:[#allocation6 + $0x160] ss:$16 sps:$4 sm:$0xff]  }
  0x3b   :  { %1084 = vmatpush1.bf16.msra.mxu0 %v1772_v19  ;;  %v1821_v52 = vld [vmem:[#allocation6 + $0x168] ss:$16 sps:$4 sm:$0xff]   ;;  %v1822_v53 = vld [vmem:[#allocation6 + $0x144] ss:$16 sps:$4 sm:$0xff]   ;;  %v1824_v54 = vld [vmem:[#allocation6 + $0x14c] ss:$16 sps:$4 sm:$0xff]  }
  0x3c   :  { %1125 = vmatpush1.bf16.msra.mxu1 %v1773_v20  ;;  %1085 = vmatprep.subr.bf16.mxu0 %v1774_v21  ;;  %v1826_v55 = vld [vmem:[#allocation6 + $0x140] ss:$16 sps:$4 sm:$0xff]   ;;  %v1827_v56 = vld [vmem:[#allocation6 + $0x148] ss:$16 sps:$4 sm:$0xff]   ;;  %v1828_v57 = vld [vmem:[#allocation6 + $0x124] ss:$16 sps:$4 sm:$0xff]  }
  0x3d   :  { %1126 = vmatprep.subr.bf16.mxu1 %v1776_v22  ;;  %v1830_v58 = vld [vmem:[#allocation6 + $0x12c] ss:$16 sps:$4 sm:$0xff]   ;;  %v1840_v59 = vld [vmem:[#allocation3] ss:$8 sps:$4 sm:$0xff]   ;;  %v1843_v63 = vld [vmem:[#allocation3 + $0x10] ss:$8 sps:$4 sm:$0xff]  }
  0x3e   :  { %v1842_v60 = vld [vmem:[#allocation3 + $0x4] ss:$8 sps:$4 sm:$0xff]   ;;  %v1832_v61 = vld [vmem:[#allocation6 + $0x120] ss:$16 sps:$4 sm:$0xff]   ;;  %v1833_v62 = vld [vmem:[#allocation6 + $0x128] ss:$16 sps:$4 sm:$0xff]  }
  0x3f   :  { %1086 = vmatpush1.bf16.msra.mxu0 %v1778_v23  ;;  %v1845_v0 = vld [vmem:[#allocation3 + $0x14] ss:$8 sps:$4 sm:$0xff]   ;;  %v1846_v1 = vld [vmem:[#allocation3 + $0x20] ss:$8 sps:$4 sm:$0xff]   ;;  %v1848_v4 = vld [vmem:[#allocation3 + $0x24] ss:$8 sps:$4 sm:$0xff]  }
  0x40   :  { %1127 = vmatpush1.bf16.msra.mxu1 %v1779_v24  ;;  %1087 = vmatprep.subr.bf16.mxu0 %v1780_v25  ;;  %v1834_v2 = vld [vmem:[#allocation6 + $0x104] ss:$16 sps:$4 sm:$0xff]   ;;  %v1836_v3 = vld [vmem:[#allocation6 + $0x10c] ss:$16 sps:$4 sm:$0xff]   ;;  %v1849_v5 = vld [vmem:[#allocation3 + $0x30] ss:$8 sps:$4 sm:$0xff]   ;;  %v266_v10 = vmax.bf16 %v1846_v1, %v1840_v59  ;;  %v291_v15 = vmax.bf16 %v1848_v4, %v1842_v60 }
  0x41   :  { %1128 = vmatprep.subr.bf16.mxu1 %v1782_v26  ;;  %v1851_v6 = vld [vmem:[#allocation3 + $0x34] ss:$8 sps:$4 sm:$0xff]   ;;  %v1852_v7 = vld [vmem:[#allocation3 + $0x40] ss:$8 sps:$4 sm:$0xff]   ;;  %v1854_v8 = vld [vmem:[#allocation3 + $0x44] ss:$8 sps:$4 sm:$0xff]   ;;  %v267_v14 = vmax.bf16 %v1849_v5, %v1843_v63 }
  0x42   :  { %v1855_v9 = vld [vmem:[#allocation3 + $0x50] ss:$8 sps:$4 sm:$0xff]   ;;  %v1857_v11 = vld [vmem:[#allocation3 + $0x54] ss:$8 sps:$4 sm:$0xff]   ;;  %v1858_v12 = vld [vmem:[#allocation3 + $0x60] ss:$8 sps:$4 sm:$0xff]   ;;  %v292_v16 = vmax.bf16 %v1851_v6, %v1845_v0  ;;  %v268_v21 = vmax.bf16 %v1852_v7, %v266_v10  ;;  %v293_v26 = vmax.bf16 %v1854_v8, %v291_v15 }
  0x43   :  { %1088 = vmatpush1.bf16.msra.mxu0 %v1784_v27  ;;  %v1860_v13 = vld [vmem:[#allocation3 + $0x64] ss:$8 sps:$4 sm:$0xff]   ;;  %v1838_v17 = vld [vmem:[#allocation6 + $0x100] ss:$16 sps:$4 sm:$0xff]   ;;  %v1863_v19 = vld [vmem:[#allocation3 + $0x74] ss:$8 sps:$4 sm:$0xff]   ;;  %v269_v25 = vmax.bf16 %v1855_v9, %v267_v14 }
  0x44   :  { %1129 = vmatpush1.bf16.msra.mxu1 %v1785_v28  ;;  %1089 = vmatprep.subr.bf16.mxu0 %v1786_v29  ;;  %v1861_v18 = vld [vmem:[#allocation3 + $0x70] ss:$8 sps:$4 sm:$0xff]   ;;  %v1864_v20 = vld [vmem:[#allocation3 + $0x80] ss:$8 sps:$4 sm:$0xff]   ;;  %v1866_v22 = vld [vmem:[#allocation3 + $0x84] ss:$8 sps:$4 sm:$0xff]   ;;  %v294_v27 = vmax.bf16 %v1857_v11, %v292_v16 }
  0x45   :  { %1130 = vmatprep.subr.bf16.mxu1 %v1788_v30  ;;  %v1867_v23 = vld [vmem:[#allocation3 + $0x90] ss:$8 sps:$4 sm:$0xff]   ;;  %v1869_v24 = vld [vmem:[#allocation3 + $0x94] ss:$8 sps:$4 sm:$0xff]   ;;  %v1870_v29 = vld [vmem:[#allocation3 + $0xa0] ss:$8 sps:$4 sm:$0xff]  }
  0x46   :  { %v1839_v28 = vld [vmem:[#allocation6 + $0x108] ss:$16 sps:$4 sm:$0xff]   ;;  %v1872_v30 = vld [vmem:[#allocation3 + $0xa4] ss:$8 sps:$4 sm:$0xff]   ;;  %v1893_v8 = vld [vmem:[#allocation3 + $0x114] ss:$8 sps:$4 sm:$0xff]  }
  0x47   :  { %1090 = vmatpush1.bf16.msra.mxu0 %v1790_v31  ;;  %v270_v31 = vmax.bf16 %v1858_v12, %v268_v21  ;;  %v1888_v5 = vld [vmem:[#allocation3 + $0x100] ss:$8 sps:$4 sm:$0xff]   ;;  %v1890_v6 = vld [vmem:[#allocation3 + $0x104] ss:$8 sps:$4 sm:$0xff]   ;;  %v1891_v7 = vld [vmem:[#allocation3 + $0x110] ss:$8 sps:$4 sm:$0xff]  }
  0x48   :  { %1131 = vmatpush1.bf16.msra.mxu1 %v1791_v32  ;;  %1091 = vmatprep.subr.bf16.mxu0 %v1792_v33  ;;  %v1873_v32 = vld [vmem:[#allocation3 + $0xb0] ss:$8 sps:$4 sm:$0xff]   ;;  %v1875_v33 = vld [vmem:[#allocation3 + $0xb4] ss:$8 sps:$4 sm:$0xff]   ;;  %v1894_v9 = vld [vmem:[#allocation3 + $0x120] ss:$8 sps:$4 sm:$0xff]  }
  0x49   :  { %1132 = vmatprep.subr.bf16.mxu1 %v1794_v34  ;;  %v1876_v34 = vld [vmem:[#allocation3 + $0xc0] ss:$8 sps:$4 sm:$0xff]   ;;  %v1896_v10 = vld [vmem:[#allocation3 + $0x124] ss:$8 sps:$4 sm:$0xff]   ;;  %v1899_v14 = vld [vmem:[#allocation3 + $0x134] ss:$8 sps:$4 sm:$0xff]  }
  0x4a   :  { %v1900_v15 = vld [vmem:[#allocation3 + $0x140] ss:$8 sps:$4 sm:$0xff]   ;;  %v1902_v16 = vld [vmem:[#allocation3 + $0x144] ss:$8 sps:$4 sm:$0xff]   ;;  %s1516_s25 = sshll.u32 %s2069_s24, 4  ;;  %s1517_s25 = int_to_ptr.vmem [resolvable:$true] %s1516_s25 }
  0x4b   :  { %1092 = vmatpush2.bf16.msra.mxu0 %v1796_v35  ;;  %v271_v35 = vmax.bf16 %v1861_v18, %v269_v25  ;;  %v536_v18 = vmax.bf16 %v1894_v9, %v1888_v5  ;;  %s2031_s26 = scalar_lea.vmem %s1517_s25, 32  ;;  %p2036_p2 = scmp.lt.s32.totalorder %s1517_s25, %s1517_s25 }
  0x4c   :  { %1133 = vmatpush2.bf16.msra.mxu1 %v1797_v36  ;;  %1093 = vmatprep.subr.bf16.mxu0 %v1798_v37  ;;  %v295_v36 = vmax.bf16 %v1860_v13, %v293_v26  ;;  %v296_v37 = vmax.bf16 %v1863_v19, %v294_v27  ;;  %v1897_v13 = vld [vmem:[#allocation3 + $0x130] ss:$8 sps:$4 sm:$0xff]   ;;  %v561_v19 = vmax.bf16 %v1896_v10, %v1890_v6  ;;  %p2032_p1 = scmp.ne.s32.totalorder %s1517_s25, %s2031_s26  ;;  %p2037_p3 = scmp.lt.s32.totalorder %s2031_s26, %s2031_s26 }
  0x4d   :  { %1134 = vmatprep.subr.bf16.mxu1 %v1800_v38  ;;  %v1878_v38 = vld [vmem:[#allocation3 + $0xc4] ss:$8 sps:$4 sm:$0xff]   ;;  %v537_v25 = vmax.bf16 %v1897_v13, %v1891_v7  ;;  %v562_v26 = vmax.bf16 %v1899_v14, %v1893_v8  ;;  %v1909_v27 = vld [vmem:[#allocation3 + $0x170] ss:$8 sps:$4 sm:$0xff]   ;;  %v1935_v7 = vld [vmem:[#allocation3 + $0x1f4] ss:$8 sps:$4 sm:$0xff]  }
  0x4e   :  { %v1933_v6 = vld [vmem:[#allocation3 + $0x1f0] ss:$8 sps:$4 sm:$0xff]   ;;  %p2038_p4 = por %p2037_p3, %p2036_p2 }
  0x4f   :  { %1094 = vmatpush2.bf16.msra.mxu0 %v1802_v39  ;;  %v1879_v39 = vld [vmem:[#allocation3 + $0xd0] ss:$8 sps:$4 sm:$0xff]  }
  0x50   :  { %1135 = vmatpush2.bf16.msra.mxu1 %v1803_v40  ;;  %1095 = vmatprep.subr.bf16.mxu0 %v1804_v41  ;;  %v1881_v40 = vld [vmem:[#allocation3 + $0xd4] ss:$8 sps:$4 sm:$0xff]   ;;  %v272_v41 = vmax.bf16 %v1864_v20, %v270_v31  ;;  %v563_v31 = vmax.bf16 %v1902_v16, %v561_v19  ;;  %p2039_p5 = pnand %p2038_p4, %p2032_p1 }
  0x51   :  { %1136 = vmatprep.subr.bf16.mxu1 %v1806_v42  ;;  %v1882_v42 = vld [vmem:[#allocation3 + $0xe0] ss:$8 sps:$4 sm:$0xff]   ;;  %v1936_v10 = vld [vmem:[#allocation8 + $0x78] sm:$0xff]  }
  0x53   :  { %1096 = vmatpush2.bf16.msra.mxu0 %v1808_v43  ;;  %v1884_v43 = vld [vmem:[#allocation3 + $0xe4] ss:$8 sps:$4 sm:$0xff]  }
  0x54   :  { %1137 = vmatpush2.bf16.msra.mxu1 %v1809_v44  ;;  %1097 = vmatprep.subr.bf16.mxu0 %v1810_v45  ;;  %v1885_v44 = vld [vmem:[#allocation3 + $0xf0] ss:$8 sps:$4 sm:$0xff]   ;;  %v273_v45 = vmax.bf16 %v1867_v23, %v271_v35  ;;  %v1906_v23 = vld [vmem:[#allocation3 + $0x160] ss:$8 sps:$4 sm:$0xff]  }
  0x55   :  { %1138 = vmatprep.subr.bf16.mxu1 %v1812_v46  ;;  %v297_v46 = vmax.bf16 %v1866_v22, %v295_v36  ;;  %v1905_v22 = vld [vmem:[#allocation3 + $0x154] ss:$8 sps:$4 sm:$0xff]   ;;  %v1915_v35 = vld [vmem:[#allocation3 + $0x190] ss:$8 sps:$4 sm:$0xff]  }
  0x57   :  { %1098 = vmatpush2.bf16.msra.mxu0 %v1814_v47  ;;  %v298_v47 = vmax.bf16 %v1869_v24, %v296_v37  ;;  %v1908_v24 = vld [vmem:[#allocation3 + $0x164] ss:$8 sps:$4 sm:$0xff]   ;;  %v564_v37 = vmax.bf16 %v1905_v22, %v562_v26 }
  0x58   :  { %1139 = vmatpush2.bf16.msra.mxu1 %v1815_v48  ;;  %1099 = vmatprep.subr.bf16.mxu0 %v1816_v49  ;;  %v1887_v48 = vld [vmem:[#allocation3 + $0xf4] ss:$8 sps:$4 sm:$0xff]   ;;  %v274_v49 = vmax.bf16 %v1870_v29, %v272_v41  ;;  %v1912_v29 = vld [vmem:[#allocation3 + $0x180] ss:$8 sps:$4 sm:$0xff]  }
  0x59   :  { %1140 = vmatprep.subr.bf16.mxu1 %v1818_v50  ;;  %v275_v50 = vmax.bf16 %v1873_v32, %v273_v45  ;;  %v1917_v41 = vld [vmem:[#allocation3 + $0x194] ss:$8 sps:$4 sm:$0xff]   ;;  %v565_v45 = vmax.bf16 %v1908_v24, %v563_v31 }
  0x5b   :  { %1100 = vmatpush2.bf16.msra.mxu0 %v1820_v51  ;;  %v299_v51 = vmax.bf16 %v1872_v30, %v297_v46  ;;  %v538_v30 = vmax.bf16 %v1900_v15, %v536_v18 }
  0x5c   :  { %1141 = vmatpush2.bf16.msra.mxu1 %v1821_v52  ;;  %1101 = vmatprep.subr.bf16.mxu0 %v1822_v53  ;;  %v300_v52 = vmax.bf16 %v1875_v33, %v298_v47  ;;  %v276_v53 = vmax.bf16 %v1876_v34, %v274_v49  ;;  %v1914_v34 = vld [vmem:[#allocation3 + $0x184] ss:$8 sps:$4 sm:$0xff]   ;;  %v1923_v49 = vld [vmem:[#allocation3 + $0x1b4] ss:$8 sps:$4 sm:$0xff]  }
  0x5d   :  { %1142 = vmatprep.subr.bf16.mxu1 %v1824_v54  ;;  %v277_v54 = vmax.bf16 %v1879_v39, %v275_v50 }
  0x5f   :  { %1102 = vmatpush2.bf16.msra.mxu0 %v1826_v55  ;;  %v301_v55 = vmax.bf16 %v1878_v38, %v299_v51  ;;  %v2067_v38 = vmov 1966171168  }
  0x60   :  { %1143 = vmatpush2.bf16.msra.mxu1 %v1827_v56  ;;  %1103 = vmatprep.subr.bf16.mxu0 %v1828_v57  ;;  %v302_v56 = vmax.bf16 %v1881_v40, %v300_v52  ;;  %v278_v57 = vmax.bf16 %v1882_v42, %v276_v53  ;;  %v323_v39 = vunpack.c.l.s4 %v2067_v38  ;;  %v325_v40 = vlaneseq  ;;  %v1918_v42 = vld [vmem:[#allocation3 + $0x1a0] ss:$8 sps:$4 sm:$0xff]   ;;  %v1926_v53 = vld [vmem:[#allocation3 + $0x1c4] ss:$8 sps:$4 sm:$0xff]  }
  0x61   :  { %1144 = vmatprep.subr.bf16.mxu1 %v1830_v58  ;;  %v279_v58 = vmax.bf16 %v1885_v44, %v277_v54  ;;  %v303_v59 = vmax.bf16 %v1884_v43, %v301_v55  ;;  %v1920_v43 = vld [vmem:[#allocation3 + $0x1a4] ss:$8 sps:$4 sm:$0xff]   ;;  %v540_v44 = vmax.bf16 %v1906_v23, %v538_v30  ;;  %v1924_v52 = vld [vmem:[#allocation3 + $0x1c0] ss:$8 sps:$4 sm:$0xff]   ;;  %v567_v55 = vmax.bf16 %v1914_v34, %v565_v45 }
  0x62   :  { %v304_v60 = vmax.bf16 %v1887_v48, %v302_v56  ;;  %v1921_v48 = vld [vmem:[#allocation3 + $0x1b0] ss:$8 sps:$4 sm:$0xff]   ;;  %vm2122_vm0 = vcmp.lt.s32.totalorder %v325_v40, 256 }
  0x63   :  { %1104 = vmatpush2.bf16.msra.mxu0 %v1832_v61  ;;  %v280_v61 = vmax.bf16 %v279_v58, %v278_v57  ;;  %v542_v54 = vmax.bf16 %v1912_v29, %v540_v44  ;;  %v1927_v58 = vld [vmem:[#allocation3 + $0x1d0] ss:$8 sps:$4 sm:$0xff]  }
  0x64   :  { %1145 = vmatpush2.bf16.msra.mxu1 %v1833_v62  ;;  %1105 = vmatprep.subr.bf16.mxu0 %v1834_v2  ;;  %v305_v62 = vmax.bf16 %v304_v60, %v303_v59  ;;  %v1929_v59 = vld [vmem:[#allocation3 + $0x1d4] ss:$8 sps:$4 sm:$0xff]  }
  0x65   :  { %1146 = vmatprep.subr.bf16.mxu1 %v1836_v3  ;;  %v281_v63 = vunpack.i.l.bf16 %v280_v61  ;;  %v282_v0 = vunpack.i.h.bf16 %v280_v61 }
  0x66   :  { %v306_v1 = vunpack.i.l.bf16 %v305_v62  ;;  %v307_v2 = vunpack.i.h.bf16 %v305_v62  ;;  %v324_v62 = vunpack.c.0.s8 %v323_v39 }
  0x67   :  { %1106 = vmatpush2.bf16.msra.mxu0 %v1838_v17  ;;  %v283_v3 = vmax.f32 %v281_v63, %v282_v0  ;;  %v1903_v17 = vld [vmem:[#allocation3 + $0x150] ss:$8 sps:$4 sm:$0xff]   ;;  %v2119_v63 = vshrl.u32 %v325_v40, 7  ;;  %v1930_v0 = vld [vmem:[#allocation3 + $0x1e0] ss:$8 sps:$4 sm:$0xff]  }
  0x68   :  { %1147 = vmatpush2.bf16.msra.mxu1 %v1839_v28  ;;  %v308_v4 = vmax.f32 %v306_v1, %v307_v2  ;;  %v1911_v28 = vld [vmem:[#allocation3 + $0x174] ss:$8 sps:$4 sm:$0xff]   ;;  %v539_v36 = vmax.bf16 %v1903_v17, %v537_v25  ;;  %v1932_v1 = vld [vmem:[#allocation3 + $0x1e4] ss:$8 sps:$4 sm:$0xff]   ;;  %v544_v2 = vmax.bf16 %v1918_v42, %v542_v54  ;;  %1687 = vmatprep.subr.bf16.mxu0 %v1936_v10 }
  0x69   :  { %v284_v11 = vrot.slane %v283_v3, 4  ;;  %v566_v51 = vmax.bf16 %v1911_v28, %v564_v37  ;;  %v1937_v17 = vld [vmem:[#allocation8 + $0xf8] sm:$0xff]   ;;  %v327_v18 = vsub.s32 %v324_v62, %v2119_v63 }
  0x6a   :  { %v309_v12 = vrot.slane %v308_v4, 4  ;;  %v541_v50 = vmax.bf16 %v1909_v27, %v539_v36  ;;  %1709 = vmatprep.subr.bf16.mxu1 %v1937_v17  ;;  %v316_v28 = vld [vmem:[#allocation2] ss:$2 sm:$0x3] }
  0x6b   :  { %v285_v20 = vmax.f32 %v283_v3, %v284_v11  ;;  %v568_v61 = vmax.bf16 %v1917_v41, %v566_v51  ;;  %v569_v3 = vmax.bf16 %v1920_v43, %v567_v55  ;;  %v546_v11 = vmax.bf16 %v1924_v52, %v544_v2  ;;  %v587_v62 = vld [vmem:[#allocation2 + $0x1] ss:$2 sm:$0x3] }
  0x6c   :  { %v310_v21 = vmax.f32 %v308_v4, %v309_v12  ;;  %v543_v60 = vmax.bf16 %v1915_v35, %v541_v50  ;;  %v618_v52 = vsub.s32 0, %v2119_v63  ;;  %v1954_v36 = vld [vmem:[#allocation8 + $0x18] sm:$0xff]  }
  0x6d   :  { %v286_v32 = vrot.slane %v285_v20, 2  ;;  %v570_v9 = vmax.bf16 %v1923_v49, %v568_v61  ;;  %v571_v12 = vmax.bf16 %v1926_v53, %v569_v3  ;;  %v548_v19 = vmax.bf16 %v1930_v0, %v546_v11  ;;  %v634_v0 = vld [vmem:[%s2158_s3] sm:$0x3] }
  0x6e   :  { %v311_v33 = vrot.slane %v310_v21, 2  ;;  %v545_v8 = vmax.bf16 %v1921_v48, %v543_v60  ;;  %v622_v53 = vsub.s32 1, %v2119_v63  ;;  %v614_v60 = vld [vmem:[%s2157_s2] sm:$0x3] }
  0x6f   :  { %v287_v46 = vmax.f32 %v285_v20, %v286_v32  ;;  %v572_v16 = vmax.bf16 %v1929_v59, %v570_v9  ;;  %v573_v20 = vmax.bf16 %v1932_v1, %v571_v12  ;;  %v619_v2 = vrot.slane %v614_v60, %v618_v52 }
  0x70   :  { %v312_v47 = vmax.f32 %v310_v21, %v311_v33  ;;  %v547_v15 = vmax.bf16 %v1927_v58, %v545_v8  ;;  %v2068_v58 = vmov 1983009808   ;;  %v623_v3 = vrot.slane %v614_v60, %v622_v53 }
  0x71   :  { %v288_v56 = vrot.slane %v287_v46, 1  ;;  %v574_v24 = vmax.bf16 %v1935_v7, %v572_v16  ;;  %v626_v59 = vunpack.c.l.s4 %v2068_v58  ;;  %v643_v7 = vrot.slane %v634_v0, %v622_v53 }
  0x72   :  { %v313_v57 = vrot.slane %v312_v47, 1  ;;  %v549_v23 = vmax.bf16 %v1933_v6, %v547_v15  ;;  %v639_v6 = vrot.slane %v634_v0, %v618_v52  ;;  %v624_v8 = vcombine.low %v619_v2, %v623_v3 }
  0x73   :  { %v289_v4 = vmax.f32 %v287_v46, %v288_v56  ;;  %v575_v27 = vmax.bf16 %v574_v24, %v573_v20  ;;  %v1941_v24 = vld [vmem:[#allocation8 + $0xf0] sm:$0xff]  }
  0x74   :  { %v314_v5 = vmax.f32 %v312_v47, %v313_v57  ;;  %v550_v26 = vmax.bf16 %v549_v23, %v548_v19  ;;  %v644_v10 = vcombine.low %v639_v6, %v643_v7  ;;  %v1940_v23 = vld [vmem:[#allocation8 + $0x70] sm:$0xff]  }
  0x75   :  { %v290_v13 = vpack.i.bf16 %v289_v4, %v289_v4  ;;  %v576_v32 = vunpack.i.l.bf16 %v575_v27  ;;  %v577_v33 = vunpack.i.h.bf16 %v575_v27  ;;  %v627_v4 = vunpack.c.0.s8 %v626_v59  ;;  %v1945_v27 = vld [vmem:[#allocation8 + $0xe8] sm:$0xff]  }
  0x76   :  { %v315_v14 = vpack.i.bf16 %v314_v5, %v314_v5  ;;  %v551_v30 = vunpack.i.l.bf16 %v550_v26  ;;  %v552_v31 = vunpack.i.h.bf16 %v550_v26  ;;  %v1944_v26 = vld [vmem:[#allocation8 + $0x68] sm:$0xff]  }
  0x77   :  { %v317_v21 = vunpack.c.l.bf16 %v290_v13  ;;  %v578_v37 = vmax.f32 %v576_v32, %v577_v33  ;;  %v2139_v9 = vsub.s32 %v627_v4, %v2119_v63  ;;  %v1942_v63 = vld [vmem:[#allocation8 + $0x30] sm:$0xff]   ;;  %v1950_v32 = vld [vmem:[#allocation8 + $0x20] sm:$0xff]  }
  0x78   :  { %v318_v22 = vunpack.c.l.bf16 %v315_v14  ;;  %v553_v35 = vmax.f32 %v551_v30, %v552_v31  ;;  %v1948_v30 = vld [vmem:[#allocation8 + $0x60] sm:$0xff]  }
  0x79   :  { %v579_v41 = vrot.slane %v578_v37, 4  ;;  %v631_v11 = vrot.slane %v624_v8, %v2139_v9  ;;  %v651_v12 = vrot.slane %v644_v10, %v2139_v9  ;;  %v1949_v31 = vld [vmem:[#allocation8 + $0xe0] sm:$0xff]  }
  0x7a   :  { %v321_v25 = vcombine.low %v317_v21, %v318_v22  ;;  %v554_v39 = vrot.slane %v553_v35, 4  ;;  %v1938_v21 = vld [vmem:[#allocation8 + $0x38] sm:$0xff]   ;;  %v1951_v33 = vld [vmem:[#allocation8 + $0xa0] sm:$0xff]  }
  0x7b   :  { %v580_v43 = vmax.f32 %v578_v37, %v579_v41  ;;  %v1939_v22 = vld [vmem:[#allocation8 + $0xb8] sm:$0xff]   ;;  %v1958_v41 = vld [vmem:[#allocation8 + $0x10] sm:$0xff]  }
  0x7c   :  { %v328_v29 = vrot.slane %v321_v25, %v327_v18  ;;  %v555_v42 = vmax.f32 %v553_v35, %v554_v39  ;;  %v1943_v25 = vld [vmem:[#allocation8 + $0xb0] sm:$0xff]   ;;  %v1953_v35 = vld [vmem:[#allocation8 + $0xd8] sm:$0xff]  }
  0x7d   :  { %v581_v45 = vrot.slane %v580_v43, 2  ;;  %v1955_v37 = vld [vmem:[#allocation8 + $0x98] sm:$0xff]   ;;  %v1957_v39 = vld [vmem:[#allocation8 + $0xd0] sm:$0xff]  }
  0x7e   :  { %v335_v34 = vrot.slane %v328_v29, %v327_v18  ;;  %v556_v44 = vrot.slane %v555_v42, 2  ;;  %v1947_v29 = vld [vmem:[#allocation8 + $0xa8] sm:$0xff]  }
  0x7f   :  { %v582_v47 = vmax.f32 %v580_v43, %v581_v45  ;;  %v1961_v43 = vld [vmem:[#allocation8 + $0x48] sm:$0xff]  }
  0x80   :  { %v337_v38 = vmax.f32 %v316_v28, %v335_v34  ;;  %v557_v46 = vmax.f32 %v555_v42, %v556_v44  ;;  %v1946_v28 = vld [vmem:[#allocation8 + $0x28] sm:$0xff]   ;;  %v1952_v34 = vld [vmem:[#allocation8 + $0x58] sm:$0xff]   ;;  %v1959_v42 = vld [vmem:[#allocation8 + $0x90] sm:$0xff]  }
  0x81   :  { %v583_v49 = vrot.slane %v582_v47, 1  ;;  %v1962_v44 = vld [vmem:[#allocation8 + $0xc8] sm:$0xff]  }
  0x82   :  { %342 = vst.msk [vmem:[#allocation2] ss:$2 sm:$0x3] %vm2122_vm0, %v337_v38  ;;  %v558_v48 = vrot.slane %v557_v46, 1  ;;  %v1956_v38 = vld [vmem:[#allocation8 + $0x50] sm:$0xff]   ;;  %v1963_v45 = vld [vmem:[#allocation8 + $0x8] sm:$0xff]  }
  0x83   :  { %v584_v40 = vmax.f32 %v582_v47, %v583_v49  ;;  %v1965_v47 = vld [vmem:[#allocation8 + $0x40] sm:$0xff]  }
  0x84   :  { %v559_v50 = vmax.f32 %v557_v46, %v558_v48  ;;  %v1964_v46 = vld [vmem:[#allocation8 + $0x88] sm:$0xff]   ;;  %v1966_v48 = vld [vmem:[#allocation8 + $0xc0] sm:$0xff]  }
  0x85   :  { %v585_v54 = vpack.i.bf16 %v584_v40, %v584_v40  ;;  %v1967_v49 = vld [vmem:[#allocation8] sm:$0xff]  }
  0x86   :  { %v560_v51 = vpack.i.bf16 %v559_v50, %v559_v50  ;;  %v1968_v50 = vld [vmem:[#allocation8 + $0x80] sm:$0xff]  }
  0x87   :  { %v589_v56 = vunpack.c.l.bf16 %v585_v54  ;;  %v732_v40 = vld [vmem:[%s2156_s1] sm:$0xff] }
  0x88   :  { %v588_v55 = vunpack.c.l.bf16 %v560_v51  ;;  %v1054_v51 = vcombine.high %v732_v40, %v732_v40  ;;  %v1061_v52 = vrot.slane %v732_v40, %v2139_v9 }
  0x8a   :  { %v592_v57 = vcombine.low %v588_v55, %v589_v56  ;;  %v1068_v53 = vrot.slane %v1054_v51, %v2139_v9  ;;  %v1069_v54 = vcombine.high %v1061_v52, %v1061_v52 }
  0x8c   :  { %v599_v61 = vrot.slane %v592_v57, %v327_v18  ;;  %v1070_v55 = vcombine.high %v1068_v53, %v1068_v53 }
  0x8e   :  { %v606_v1 = vrot.slane %v599_v61, %v327_v18 }
  0x90   :  { %v608_v5 = vmax.f32 %v587_v62, %v606_v1 }
  0x92   :  { %609 = vst.msk [vmem:[#allocation2 + $0x1] ss:$2 sm:$0x3] %vm2122_vm0, %v608_v5 }
  0x99   :  { %v613_v13 = vld [vmem:[#allocation2] sm:$0xf] }
  0x9a   :  { %v633_v14 = vmul.f32 %v631_v11, %v613_v13 }
  0x9c   :  { %v653_v15 = vadd.f32 %v651_v12, %v633_v14 }
  0x9e   :  { %v654_v16 = vmax.f32 %v653_v15, 0.0  ;;  %v1654_v15 = vld [vmem:[%s2161_s6] ss:$0 sm:$0xff] }
  0xa0   :  { %v662_v17 = vrot.slane %v654_v16, %v2139_v9 }
  0xa2   :  { %v663_v18 = vcombine.high %v662_v17, %v662_v17  ;;  %v666_v19 = vpack.c.bf16 %v662_v17, %v662_v17 }
  0xa4   :  { %v667_v20 = vpack.c.bf16 %v663_v18, %v663_v18 }
  0xa6   :  { %1107 = vmatprep.mubr.bf16.mxu0 %v667_v20  ;;  %1148 = vmatprep.mubr.bf16.mxu1 %v667_v20 }
  0xa7   :  { %1108 = vmatmul.mubr.bf16.vlgmr.msra.gmra.mxu0 %v666_v19  ;;  %1149 = vmatmul.mubr.bf16.vlgmr.msra.gmra.mxu1 %v666_v19 }
  0xa8   :  { %1688 = vmatpush3.bf16.msra.mxu0 %v1938_v21  ;;  %1710 = vmatpush3.bf16.msra.mxu1 %v1939_v22 }
  0xa9   :  { %1689 = vmatprep.subr.bf16.mxu0 %v1940_v23  ;;  %1711 = vmatprep.subr.bf16.mxu1 %v1941_v24 }
  0xac   :  { %1690 = vmatpush3.bf16.msra.mxu0 %v1942_v63  ;;  %1712 = vmatpush3.bf16.msra.mxu1 %v1943_v25 }
  0xad   :  { %1691 = vmatprep.subr.bf16.mxu0 %v1944_v26  ;;  %1713 = vmatprep.subr.bf16.mxu1 %v1945_v27 }
  0xb0   :  { %1692 = vmatpush3.bf16.msra.mxu0 %v1946_v28  ;;  %1714 = vmatpush3.bf16.msra.mxu1 %v1947_v29 }
  0xb1   :  { %1693 = vmatprep.subr.bf16.mxu0 %v1948_v30  ;;  %1715 = vmatprep.subr.bf16.mxu1 %v1949_v31 }
  0xb4   :  { %1694 = vmatpush3.bf16.msra.mxu0 %v1950_v32  ;;  %1716 = vmatpush3.bf16.msra.mxu1 %v1951_v33 }
  0xb5   :  { %1695 = vmatprep.subr.bf16.mxu0 %v1952_v34  ;;  %1717 = vmatprep.subr.bf16.mxu1 %v1953_v35 }
  0xb8   :  { %1696 = vmatpush3.bf16.msra.mxu0 %v1954_v36  ;;  %1718 = vmatpush3.bf16.msra.mxu1 %v1955_v37 }
  0xb9   :  { %1697 = vmatprep.subr.bf16.mxu0 %v1956_v38  ;;  %1719 = vmatprep.subr.bf16.mxu1 %v1957_v39 }
  0xbc   :  { %1698 = vmatpush3.bf16.msra.mxu0 %v1958_v41  ;;  %1720 = vmatpush3.bf16.msra.mxu1 %v1959_v42 }
  0xbd   :  { %1699 = vmatprep.subr.bf16.mxu0 %v1961_v43  ;;  %1721 = vmatprep.subr.bf16.mxu1 %v1962_v44 }
  0xc0   :  { %1700 = vmatpush3.bf16.msra.mxu0 %v1963_v45  ;;  %1722 = vmatpush3.bf16.msra.mxu1 %v1964_v46 }
  0xc1   :  { %1701 = vmatprep.subr.bf16.mxu0 %v1965_v47  ;;  %1723 = vmatprep.subr.bf16.mxu1 %v1966_v48 }
  0xc4   :  { %1702 = vmatpush3.bf16.msra.mxu0 %v1967_v49  ;;  %1724 = vmatpush3.bf16.msra.mxu1 %v1968_v50 }
 0x167   :  { %v1109_v56 = vpop.f32.mrf.mxu0  ;;  %v1150_v57 = vpop.f32.mrf.mxu1 }
 0x168   :  { %v1110_v58 = vadd.f32 %v1109_v56, %v1061_v52  ;;  %v1151_v59 = vadd.f32 %v1150_v57, %v1068_v53 }
 0x169   :  { %v1111_v60 = vpop.f32.mrf.mxu0  ;;  %v1152_v61 = vpop.f32.mrf.mxu1 }
 0x16a   :  { %v1159_v62 = vmax.f32 %v1151_v59, 0.0  ;;  %v1112_v0 = vadd.f32 %v1111_v60, %v1069_v54  ;;  %v1153_v1 = vadd.f32 %v1152_v61, %v1070_v55  ;;  %v1157_v2 = vmax.f32 %v1110_v58, 0.0 }
 0x16b   :  { %v1113_v3 = vpop.f32.mrf.mxu0  ;;  %v1154_v4 = vpop.f32.mrf.mxu1 }
 0x16c   :  { %v1158_v5 = vmax.f32 %v1112_v0, 0.0  ;;  %v1160_v6 = vmax.f32 %v1153_v1, 0.0  ;;  %v1163_v7 = vpack.c.bf16 %v1159_v62, %v1159_v62  ;;  %v1161_v12 = vpack.c.bf16 %v1157_v2, %v1157_v2 }
 0x16d   :  { %v1114_v8 = vpop.f32.mrf.mxu0  ;;  %v1155_v10 = vpop.f32.mrf.mxu1 }
 0x16e   :  { %v1162_v9 = vpack.c.bf16 %v1158_v5, %v1158_v5  ;;  %v1164_v11 = vpack.c.bf16 %v1160_v6, %v1160_v6 }
 0x170   :  { %1460 = vmatprep.mubr.bf16.mxu0 %v1162_v9  ;;  %1500 = vmatprep.mubr.bf16.mxu1 %v1164_v11 }
 0x171   :  { %1461 = vmatmul.mubr.bf16.vlgmr.msra.gmra.mxu0 %v1161_v12  ;;  %1501 = vmatmul.mubr.bf16.vlgmr.msra.gmra.mxu1 %v1163_v7 }
 0x231   :  { %v1703_v13 = vpop.f32.mrf.mxu0  ;;  %v1725_v14 = vpop.f32.mrf.mxu1 }
 0x233   :  { %v1704_v16 = vpop.f32.mrf.mxu0  ;;  %v1726_v17 = vpop.f32.mrf.mxu1 }
 0x234   :  { %v1705_v18 = vadd.f32 %v1704_v16, %v1703_v13  ;;  %v1727_v22 = vadd.f32 %v1726_v17, %v1725_v14 }
 0x235   :  { %v1706_v19 = vpop.f32.mrf.mxu0  ;;  %v1728_v20 = vpop.f32.mrf.mxu1 }
 0x236   :  { %v1463_v21 = vadd.f32 %v1705_v18, %v1654_v15 }
 0x237   :  { %v1707_v23 = vpop.f32.mrf.mxu0  ;;  %v1729_v24 = vpop.f32.mrf.mxu1 }
 0x238   :  { %v1503_v63 = vadd.f32 %v1727_v22, %v1463_v21 }
 0x23a   :  { %1969 = vtanh.f32 %v1503_v63 }
 0x247   :  { %v1970_v25 = vpop.eup %1969 }
 0x248   :  { %1509 = vst [vmem:[#allocation9] sm:$0x3] %v1970_v25 }
 0x249   :  { %2042 = shalt.err (!%p2039_p5)
}
 0x24a   :  { %1519 = dma.vmem_to_hbm [thread:$0]  %s1517_s25, 32, %s2162_s7, [#allocation5]  }
 0x24b   :  { %2055 = dma.done.wait [#allocation5], 32  }
 0x24c   :  { %2056 = vsyncadd [#allocation5], 4294967264 }
 0x24d   :  { %1523 = vsyncpa [#allocation4], 1 }
 0x24e   :  { %1524 = vsyncpa [#allocation7], 1 }
 0x24f   :  { %1525 = vsyncpa [#allocation5], 1 }

</bundles_post_ra>
